<compile_context>
chip_gen: v7x
topology: tpu7x:2x2x1
jax: 0.10.0
libtpu: 0.0.40
codegen_flags: <defaults>
</compile_context>

<pallas_src>
import math
import numpy as np
import jax
import jax.numpy as jnp
from jax import lax
from jax.experimental import pallas as pl
from jax.experimental.pallas import tpu as pltpu

_LANE = 128


def _round_up(x, m):
    return ((x + m - 1) // m) * m


def _itemsize(dt):
    return jnp.dtype(dt).itemsize


def _divisors_desc(n):
    ds = set()
    d = 1
    while d * d <= n:
        if n % d == 0:
            ds.add(d)
            ds.add(n // d)
        d += 1
    return sorted(ds, reverse=True)


def _vmem_capacity_bytes():
    """Physical VMEM per TensorCore (128 MiB on v4/v5e/v6e, 64 MiB on v7x)."""
    try:
        cap = int(pltpu.get_tpu_info().vmem_capacity_bytes)
    except Exception:  # config query helper only (not a kernel fallback)
        cap = 64 * 1024 * 1024
    return max(cap, 16 * 1024 * 1024)


_VMEM_CAP = _vmem_capacity_bytes()
# ~3/8 of VMEM as the tile working-set budget, half of VMEM as the explicit
# Mosaic scoped limit.  v5e/v6e (128 MiB) -> 48/64 MiB; v7x (64 MiB/TC) -> 24/32.
_VMEM_BUDGET = (_VMEM_CAP * 3) // 8
_VMEM_LIMIT = _VMEM_CAP // 2
# Only chips with >1 TensorCore per chip (v7x: 64 MiB VMEM/TC) gain from
# shrinking tiles to keep >= 2 steps on the parallel grid axis.
_WANT_MULTI_STEP = _VMEM_CAP < 100 * 1024 * 1024


def _nearest_resize(x, Hout, Wout):
    """F.interpolate(mode='nearest') semantics: src = floor(dst * in / out)."""
    N, Hin, Win, C = x.shape
    hi = (jnp.arange(Hout) * Hin) // Hout
    wi = (jnp.arange(Wout) * Win) // Wout
    return x[:, hi][:, :, wi]


# ----------------------------------------------------------------------------
# tile pickers (VMEM-budget / generation aware)
# ----------------------------------------------------------------------------
def _pick_tm(M, row_mult, bytes_per_row, fixed_bytes):
    """Largest divisor of M (multiple of row_mult) whose working set fits VMEM."""
    cands = [d for d in _divisors_desc(M) if d % row_mult == 0 or d == M]
    best = None
    for tm in cands:
        if fixed_bytes + tm * bytes_per_row > _VMEM_BUDGET:
            continue
        if best is None:
            best = tm
        if not _WANT_MULTI_STEP or M // tm >= 2:
            return tm
    return best if best is not None else cands[-1]


def _pick_rpb(N, H, W, K, Cp, xb, wb, row_mult):
    """Even H-row count per block for the fused 1x1 + top-down-add kernel."""
    fixed = 2 * (K * Cp * wb + Cp * 4)
    per_row = 2 * K * xb + 3 * Cp * xb + 2 * Cp * 4
    best = None
    for rpb in _divisors_desc(H):
        if rpb % 2 or (rpb * W) % row_mult:
            continue
        if fixed + rpb * W * per_row > _VMEM_BUDGET:
            continue
        if best is None:
            best = rpb
        if not _WANT_MULTI_STEP or (N * H) // rpb >= 2:
            return rpb
    return best


def _pick_th_3x3(N, Hk, Wk, C, Cp, xb, wb, row_mult):
    """H-rows per tile for the fused-halo 3x3 kernel."""
    fixed = 2 * (9 * C * Cp * wb + Cp * 4)
    best = None
    for th in _divisors_desc(Hk):
        rows = th * Wk
        if rows % row_mult:
            continue
        v = (fixed
             + 3 * 3 * (th + 2) * Wk * C * xb      # double-buffered shifted slabs (+ slack)
             + rows * 9 * C * xb                   # fused-im2col LHS temp
             + rows * Cp * 4                       # f32 matmul result
             + 2 * rows * Cp * xb)                 # output block (double buffered)
        if v > _VMEM_BUDGET:
            continue
        if best is None:
            best = th
        if not _WANT_MULTI_STEP or N * (Hk // th) >= 2:
            return th
    return best if best is not None else 1


# ----------------------------------------------------------------------------
# matmul + bias (+ optional fused residual add) kernel (1x1 "inner" conv core)
# ----------------------------------------------------------------------------
def _matmul_bias(x2d, w, b, *, residual=None, rep=1, seg_w=None, tm=None):
    """out[m, co] = x2d[m, :] @ w[:, co] + b[co] (+ residual).

    rep == 1: residual has M rows, added row-for-row.
    rep == 2: residual has M//2 rows (coarse, already W-duplicated top-down map);
              every run of `seg_w` residual rows (one coarse H-row) is duplicated
              in-kernel (2x nearest upsample along H) before the add.
    """
    M, K = x2d.shape
    Cout = w.shape[1]
    b2 = b.reshape(1, Cout).astype(jnp.float32)
    grid = (M // tm,)

    in_specs = [
        pl.BlockSpec((tm, K), lambda i: (i, 0)),
        # TODO(synk): pipeline_mode=pl.Buffered(1) on the constant-index weight /
        # bias specs would reclaim one buffer each if supported by this jax build.
        pl.BlockSpec((K, Cout), lambda i: (0, 0)),
        pl.BlockSpec((1, Cout), lambda i: (0, 0)),
    ]
    args = [x2d, w, b2]

    if residual is None:
        def kernel(x_ref, w_ref, b_ref, o_ref):
            acc = jnp.dot(x_ref[...], w_ref[...],
                          preferred_element_type=jnp.float32)
            o_ref[...] = (acc + b_ref[...]).astype(o_ref.dtype)
    else:
        rrows = tm // rep
        in_specs.append(pl.BlockSpec((rrows, Cout), lambda i: (i, 0)))
        args.append(residual)

        def kernel(x_ref, w_ref, b_ref, r_ref, o_ref):
            acc = jnp.dot(x_ref[...], w_ref[...],
                          preferred_element_type=jnp.float32)
            r = r_ref[...].astype(jnp.float32)
            if rep == 2:
                # Fused 2x nearest upsample along H: residual rows arrive as runs
                # of seg_w (one run per coarse H-row, already W-duplicated);
                # duplicate each run.  seg_w is sublane-aligned, so the reshapes
                # only split/merge sublane groups (lane dim untouched).
                kgrp = tm // (2 * seg_w)
                r = r.reshape(kgrp, seg_w, Cout)
                r = jnp.broadcast_to(r[:, None, :, :], (kgrp, 2, seg_w, Cout))
                r = r.reshape(tm, Cout)
            o_ref[...] = (acc + b_ref[...] + r).astype(o_ref.dtype)

    return pl.pallas_call(
        kernel,
        out_shape=jax.ShapeDtypeStruct((M, Cout), x2d.dtype),
        grid_spec=pltpu.PrefetchScalarGridSpec(
            num_scalar_prefetch=0,
            grid=grid,
            in_specs=in_specs,
            out_specs=pl.BlockSpec((tm, Cout), lambda i: (i, 0)),
        ),
        compiler_params=pltpu.CompilerParams(
            dimension_semantics=("parallel",),
            vmem_limit_bytes=_VMEM_LIMIT),
    )(*args)


# ----------------------------------------------------------------------------
# 1x1 "inner" conv, with fused top-down nearest-upsample + add
# ----------------------------------------------------------------------------
def conv1x1(x, w, b, top_down=None, row_mult=8):
    """x: (N,H,W,K) NHWC with K % 128 == 0.  w: (K, Cp), b: (Cp,) f32.
    top_down: coarse (N, Hc, Wc, Cp) map; when given, the 2x nearest upsample +
    add (`inner_lateral + inner_top_down`) is fused."""
    N, H, W, K = x.shape
    Cp = w.shape[1]
    M = N * H * W
    x2d = x.reshape(M, K)
    xb = _itemsize(x.dtype)
    wb = _itemsize(w.dtype)
    fixed = 2 * (K * Cp * wb + Cp * 4)

    if top_down is None:
        per_row = 2 * K * xb + 2 * Cp * xb + Cp * 4
        tm = _pick_tm(M, row_mult, per_row, fixed)
        out = _matmul_bias(x2d, w, b, tm=tm)
        return out.reshape(N, H, W, Cp)

    Hc, Wc = top_down.shape[1], top_down.shape[2]
    if H == 2 * Hc and W == 2 * Wc and W % row_mult == 0:
        rpb = _pick_rpb(N, H, W, K, Cp, xb, wb, row_mult)
        if rpb is not None:
            # Only the W-duplicated *coarse* map (half the fine row count) is
            # materialized; the 2x H-duplication + add run inside the kernel.
            # TODO(synk): also fuse the 2x W-duplication in-kernel (needs a
            # sublane interleave Mosaic's reshape path may not lower cleanly).
            r2d = jnp.repeat(top_down, 2, axis=2).reshape(M // 2, Cp)
            out = _matmul_bias(x2d, w, b, residual=r2d, rep=2, seg_w=W,
                               tm=rpb * W)
            return out.reshape(N, H, W, Cp)

    # General path (non-2x scale factors or lane-unfriendly W): materialize the
    # full-resolution nearest resize and fuse only the add.
    r2d = _nearest_resize(top_down, H, W).reshape(M, Cp)
    per_row = 2 * K * xb + 4 * Cp * xb + 2 * Cp * 4
    tm = _pick_tm(M, row_mult, per_row, fixed)
    out = _matmul_bias(x2d, w, b, residual=r2d, rep=1, seg_w=W, tm=tm)
    return out.reshape(N, H, W, Cp)


# ----------------------------------------------------------------------------
# 3x3 "layer" conv: fused halo im2col, double-buffered shifted-slab DMA,
# single K = 9*C MXU matmul per tile
# ----------------------------------------------------------------------------
def conv3x3(x, w9k, b, row_mult=8):
    """3x3 conv, padding=1, stride=1.  x: (N,H,W,C) with C % 128 == 0.
    w9k: (9*C, Cp) tap-major weights (row block t = kx*3 + ky holds
    HWIO[ky, kx, :, :]).  b: (Cp,) f32."""
    N, H, W, C = x.shape
    Cp = w9k.shape[-1]
    Hk = _round_up(H, 8)
    Wk = _round_up(W, row_mult)
    xb = _itemsize(x.dtype)
    wb = _itemsize(w9k.dtype)
    th = _pick_th_3x3(N, Hk, Wk, C, Cp, xb, wb, row_mult)
    nb = Hk // th
    Mk = N * Hk * Wk

    # conv zero pad (1 each side) plus right/bottom padding up to (Hk, Wk);
    # extra rows/cols only see zeros and are cropped after the kernel.
    xp = jnp.pad(x, ((0, 0), (1, Hk - H + 1), (1, Wk - W + 1), (0, 0)))
    b2 = b.reshape(1, Cp).astype(jnp.float32)

    def kernel(xp_hbm, w_ref, b_ref, o_ref, slabs, sems):
        n = pl.program_id(0)
        i = pl.program_id(1)
        nsteps = pl.num_programs(1)
        cur = i % 2

        def start_fetch(tile, slot):
            row0 = pl.multiple_of(tile * th, th)
            for kx in range(3):
                pltpu.make_async_copy(
                    xp_hbm.at[n, pl.ds(row0, th + 2), pl.ds(kx, Wk), :],
                    slabs.at[slot, kx],
                    sems.at[slot, kx]).start()

        # Prime the pipeline at the start of each image's H-tile sweep.
        @pl.when(i == 0)
        def _():
            start_fetch(i, cur)

        # Prefetch the next H-tile behind this tile's matmul.
        @pl.when(i + 1 < nsteps)
        def _():
            start_fetch(i + 1, 1 - cur)

        # Wait for the current tile's three kx-shifted slabs.
        row0 = pl.multiple_of(i * th, th)
        for kx in range(3):
            pltpu.make_async_copy(
                xp_hbm.at[n, pl.ds(row0, th + 2), pl.ds(kx, Wk), :],
                slabs.at[cur, kx],
                sems.at[cur, kx]).wait()

        # Fused im2col in VMEM: every slice below is sublane/lane aligned
        # (Wk % row_mult == 0, C % 128 == 0), and the lane concat pieces are
        # 128-multiples, so no relayouts are generated.
        pieces = []
        for kx in range(3):
            flat = slabs[cur, kx].reshape((th + 2) * Wk, C)
            for ky in range(3):
                pieces.append(flat[ky * Wk:ky * Wk + th * Wk])
        lhs = jnp.concatenate(pieces, axis=-1)            # (th*Wk, 9*C)
        out = jnp.dot(lhs, w_ref[...], preferred_element_type=jnp.float32)
        o_ref[...] = (out + b_ref[...]).astype(o_ref.dtype)

    out = pl.pallas_call(
        kernel,
        out_shape=jax.ShapeDtypeStruct((Mk, Cp), x.dtype),
        grid_spec=pltpu.PrefetchScalarGridSpec(
            num_scalar_prefetch=0,
            grid=(N, nb),
            in_specs=[
                pl.BlockSpec(memory_space=pl.ANY),                 # padded x (HBM)
                pl.BlockSpec((9 * C, Cp), lambda n, i: (0, 0)),    # tap weights
                pl.BlockSpec((1, Cp), lambda n, i: (0, 0)),        # bias
            ],
            out_specs=pl.BlockSpec((th * Wk, Cp), lambda n, i: (n * nb + i, 0)),
            scratch_shapes=[
                pltpu.VMEM((2, 3, th + 2, Wk, C), x.dtype),        # shifted halo slabs
                pltpu.SemaphoreType.DMA((2, 3)),
            ],
        ),
        compiler_params=pltpu.CompilerParams(
            dimension_semantics=("parallel", "arbitrary"),
            vmem_limit_bytes=_VMEM_LIMIT),
    )(xp, w9k, b2)
    out = out.reshape(N, Hk, Wk, Cp)
    return out[:, :H, :W, :]


# ----------------------------------------------------------------------------
# FPN forward (mirrors FeaturePyramidNetwork.forward, extra_blocks=None)
# ----------------------------------------------------------------------------
def fpn_forward(feat_dict_nchw, params, compute_dtype=jnp.float32):
    names = list(feat_dict_nchw.keys())
    feats_nchw = list(feat_dict_nchw.values())
    out_dtype = feats_nchw[0].dtype
    act_dtype = (jnp.bfloat16
                 if jnp.dtype(compute_dtype) == jnp.dtype(jnp.bfloat16)
                 else jnp.float32)
    row_mult = 16 if act_dtype == jnp.bfloat16 else 8

    inner_ws, inner_bs, layer_ws, layer_bs = params
    Cout = inner_ws[0].shape[1]
    Cp = _round_up(Cout, _LANE)      # lane-dense channel padding
    pc = Cp - Cout
    n = len(feats_nchw)

    # NHWC, input channels padded to a 128 multiple, cast once to the act dtype
    # (keeps the in-kernel MXU operands cast-free; see v5e review item).
    feats, kcs = [], []
    for v in feats_nchw:
        xh = jnp.transpose(v, (0, 2, 3, 1))
        cin = xh.shape[-1]
        kc = _round_up(cin, _LANE)
        xh = jnp.pad(xh, ((0, 0), (0, 0), (0, 0), (0, kc - cin))).astype(act_dtype)
        feats.append(xh)
        kcs.append(kc)

    iw = [jnp.pad(w, ((0, kc - w.shape[0]), (0, pc))).astype(act_dtype)
          for w, kc in zip(inner_ws, kcs)]
    ib = [jnp.pad(b, (0, pc)).astype(jnp.float32) for b in inner_bs]
    # layer (3x3) weights: HWIO -> (kx, ky, ci, co) -> (9*Cp, Cp) tap-major rows
    lw = [jnp.transpose(jnp.pad(w, ((0, 0), (0, 0), (0, pc), (0, pc))),
                        (1, 0, 2, 3)).reshape(9 * Cp, Cp).astype(act_dtype)
          for w in layer_ws]
    lb = [jnp.pad(b, (0, pc)).astype(jnp.float32) for b in layer_bs]

    last_inner = conv1x1(feats[-1], iw[-1], ib[-1], row_mult=row_mult)
    results = [conv3x3(last_inner, lw[-1], lb[-1], row_mult=row_mult)]
    for idx in range(n - 2, -1, -1):
        # fused: 1x1 lateral conv + 2x nearest top-down upsample + add
        last_inner = conv1x1(feats[idx], iw[idx], ib[idx], top_down=last_inner,
                             row_mult=row_mult)
        results.insert(0, conv3x3(last_inner, lw[idx], lb[idx], row_mult=row_mult))

    # strip channel padding, back to NCHW / input dtype, original names
    return {k: jnp.transpose(v[..., :Cout], (0, 3, 1, 2)).astype(out_dtype)
            for k, v in zip(names, results)}


# ----------------------------------------------------------------------------
# Deterministic parameter init (matches nn.init.kaiming_uniform_(a=1), bias=0)
# ----------------------------------------------------------------------------
def _kaiming_uniform(key, shape, fan_in, a=1.0):
    gain = math.sqrt(2.0 / (1.0 + a * a))
    bound = gain * math.sqrt(3.0 / fan_in)
    return jax.random.uniform(key, shape, jnp.float32, -bound, bound)


def init_fpn_params(key, in_channels_list, out_channels):
    inner_ws, inner_bs, layer_ws, layer_bs = [], [], [], []
    for cin in in_channels_list:
        key, k1, k2 = jax.random.split(key, 3)
        inner_ws.append(_kaiming_uniform(k1, (cin, out_channels), fan_in=cin))
        inner_bs.append(jnp.zeros((out_channels,), jnp.float32))
        layer_ws.append(_kaiming_uniform(k2, (3, 3, out_channels, out_channels),
                                         fan_in=out_channels * 9))
        layer_bs.append(jnp.zeros((out_channels,), jnp.float32))
    return inner_ws, inner_bs, layer_ws, layer_bs


# ----------------------------------------------------------------------------
# Pure-JAX reference (for correctness check of the Pallas path)
# ----------------------------------------------------------------------------
def _ref_fpn_forward(feat_dict_nchw, params):
    names = list(feat_dict_nchw.keys())
    feats = [jnp.transpose(v, (0, 2, 3, 1)) for v in feat_dict_nchw.values()]
    inner_ws, inner_bs, layer_ws, layer_bs = params
    prec = lax.Precision.HIGHEST

    def c1(x, w, b):
        w4 = w.reshape(1, 1, *w.shape)
        return lax.conv_general_dilated(
            x, w4, (1, 1), 'VALID',
            dimension_numbers=('NHWC', 'HWIO', 'NHWC'), precision=prec) + b

    def c3(x, w, b):
        return lax.conv_general_dilated(
            x, w, (1, 1), 'SAME',
            dimension_numbers=('NHWC', 'HWIO', 'NHWC'), precision=prec) + b

    n = len(feats)
    last_inner = c1(feats[-1], inner_ws[-1], inner_bs[-1])
    results = [c3(last_inner, layer_ws[-1], layer_bs[-1])]
    for idx in range(n - 2, -1, -1):
        x = feats[idx]
        td = _nearest_resize(last_inner, x.shape[1], x.shape[2])
        last_inner = c1(x, inner_ws[idx], inner_bs[idx]) + td
        results.insert(0, c3(last_inner, layer_ws[idx], layer_bs[idx]))
    return {k: jnp.transpose(v, (0, 3, 1, 2)) for k, v in zip(names, results)}


# ----------------------------------------------------------------------------
if __name__ == "__main__":
    key = jax.random.PRNGKey(0)

    # small FPN config: 4 feature levels, increasing depth order (like C2..C5)
    in_channels_list = [4, 8, 16, 32]
    out_channels = 8              # < 128 -> exercises the lane-padding path
    spatial = [64, 32, 16, 8]
    N = 2

    key, pkey = jax.random.split(key)
    params = init_fpn_params(pkey, in_channels_list, out_channels)

    feats = {}
    for i, (c, s) in enumerate(zip(in_channels_list, spatial)):
        key, k = jax.random.split(key)
        feats[f"feat{i}"] = jax.random.normal(k, (N, c, s, s), jnp.float32)  # NCHW

    # f32 MXU operands: checked tightly against the lax.conv reference
    out = fpn_forward(feats, params)
    out = {k: jax.block_until_ready(v) for k, v in out.items()}

    ref = _ref_fpn_forward(feats, params)
    for name in feats:
        assert out[name].shape == (N, out_channels,
                                   feats[name].shape[2], feats[name].shape[3])
        np.testing.assert_allclose(np.asarray(out[name]), np.asarray(ref[name]),
                                   rtol=3e-4, atol=3e-4)

    # bf16 end-to-end (v5e/v6e/v7x fast path): same kernels, looser tolerance
    out_bf16 = fpn_forward(feats, params, compute_dtype=jnp.bfloat16)
    out_bf16 = {k: jax.block_until_ready(v) for k, v in out_bf16.items()}
    for name in feats:
        np.testing.assert_allclose(np.asarray(out_bf16[name]),
                                   np.asarray(ref[name]), rtol=2e-1, atol=2e-1)

    print("KERNEL_OK")
</pallas_src>

<mosaic_0001>
module attributes {stable_mosaic.version = 11 : i64} {
  func.func @kernel(%arg0: i32, %arg1: memref<64x128xf32, #tpu.memory_space<vmem>>, %arg2: memref<128x128xf32, #tpu.memory_space<vmem>>, %arg3: memref<1x128xf32, #tpu.memory_space<vmem>>, %arg4: memref<64x128xf32, #tpu.memory_space<vmem>>) attributes {dimension_semantics = [#tpu.dimension_semantics<parallel>], iteration_bounds = array<i64: 2>, scalar_prefetch = 0 : i64, scratch_operands = 0 : i64, tpu.core_type = #tpu.core_type<tc>, window_params = [{transform_indices = @transform_0, window_bounds = array<i64: 64, 128>}, {pipeline_mode = #tpu.pipeline_mode<synchronous>, transform_indices = @transform_1, window_bounds = array<i64: 128, 128>}, {pipeline_mode = #tpu.pipeline_mode<synchronous>, transform_indices = @transform_2, window_bounds = array<i64: 1, 128>}, {transform_indices = @transform_3, window_bounds = array<i64: 64, 128>}]} {
    %c0 = arith.constant 0 : index
    %c0_0 = arith.constant 0 : index
    %0 = vector.load %arg1[%c0, %c0_0] : memref<64x128xf32, #tpu.memory_space<vmem>>, vector<64x128xf32>
    %c0_1 = arith.constant 0 : index
    %c0_2 = arith.constant 0 : index
    %1 = vector.load %arg2[%c0_1, %c0_2] : memref<128x128xf32, #tpu.memory_space<vmem>>, vector<128x128xf32>
    %cst = arith.constant dense<0.000000e+00> : vector<64x128xf32>
    %2 = tpu.matmul %0, %1, %cst {dimension_numbers = #tpu.dot_dimension_numbers<[1], [0], [0], [1], [0, 0, 1, 1], [], []>} : vector<64x128xf32>, vector<128x128xf32>, vector<64x128xf32> -> vector<64x128xf32>
    %c0_3 = arith.constant 0 : index
    %c0_4 = arith.constant 0 : index
    %3 = vector.load %arg3[%c0_3, %c0_4] : memref<1x128xf32, #tpu.memory_space<vmem>>, vector<1x128xf32>
    %4 = vector.broadcast %3 : vector<1x128xf32> to vector<64x128xf32>
    %5 = arith.addf %2, %4 : vector<64x128xf32>
    %c0_5 = arith.constant 0 : index
    %c0_6 = arith.constant 0 : index
    %6 = vector.load %arg4[%c0_5, %c0_6] : memref<64x128xf32, #tpu.memory_space<vmem>>, vector<64x128xf32>
    tpu.vector_store %arg4[%c0_5, %c0_6], %5 {strides = array<i32>} : memref<64x128xf32, #tpu.memory_space<vmem>>, vector<64x128xf32>,
    return
  }
  func.func @transform_0(%arg0: i32) -> (i32, i32) {
    %c0_i32 = arith.constant 0 : i32
    %c0_i32_0 = arith.constant 0 : i32
    return %arg0, %c0_i32 : i32, i32
  }
  func.func @transform_1(%arg0: i32) -> (i32, i32) {
    %c0_i32 = arith.constant 0 : i32
    %c0_i32_0 = arith.constant 0 : i32
    %c0_i32_1 = arith.constant 0 : i32
    return %c0_i32, %c0_i32_0 : i32, i32
  }
  func.func @transform_2(%arg0: i32) -> (i32, i32) {
    %c0_i32 = arith.constant 0 : i32
    %c0_i32_0 = arith.constant 0 : i32
    %c0_i32_1 = arith.constant 0 : i32
    return %c0_i32, %c0_i32_0 : i32, i32
  }
  func.func @transform_3(%arg0: i32) -> (i32, i32) {
    %c0_i32 = arith.constant 0 : i32
    %c0_i32_0 = arith.constant 0 : i32
    return %arg0, %c0_i32 : i32, i32
  }
}

</mosaic_0001>

<bundles_post_ra>
// kernel: tpu_custom_call.1
= control target key start
LH: loop header
LB: loop body
LE: loop exit
PB: predicated region body
PF: predicated region fallthrough
CT: control target
= control target key end

     0   :  { %8 = vsyncpa [#allocation3], 0  ;;  %s1024_s0 = inlined_call_operand.hbm [shape: f32[128,128], index: 0, kind: input, shape index: {}]   ;;  %s1025_s1 = inlined_call_operand.hbm [shape: f32[128,128], index: 1, kind: input, shape index: {}]   ;;  %s1026_s2 = inlined_call_operand.vmem [shape: f32[1,128], index: 2, kind: input, shape index: {}]   ;;  %s1027_s3 = inlined_call_operand.hbm [shape: f32[128,128], index: 3, kind: output, shape index: {}]  }
   0x1   :  { %10 = vsyncpa [#allocation3 + $0x1], 0 }
   0x2   :  { %11 = vsyncpa [#allocation6], 0 }
   0x3   :  { %12 = vsyncpa [#allocation4], 0 }
   0x4   :  { %14 = vsyncpa [#allocation4 + $0x1], 0  ;;  %s800_s12 = smov 0   ;;  %s802_s13 = smov 0  }
   0x5   :  { %s804_s14 = smov 0   ;;  %s806_s15 = smov 0  }
   0x6 LB: > { %s821_s16 = sadd.s32 4294967295, %s771_s15   ;;  %s447_s17 = sadd.s32 4294967294, %s771_s15   ;;  %s771_s15 = sphi %s806_s15, %s1047_s15   ;;  %s767_s14 = sphi %s804_s14, %s1046_s14   ;;  %s763_s13 = sphi %s802_s13, %s1045_s13   ;;  %s759_s12 = sphi %s800_s12, %s1044_s12  }
   0x7   : > { %p40_p0 = scmp.ne.s32.totalorder %s763_s13, %s759_s12  ;;  %p1028_p1 = scmp.eq.s32.totalorder %s821_s16, 0 }
   0x8   : > { %p112_p3 = scmp.eq.s32.totalorder %s447_s17, 1  ;;  %p448_p5 = scmp.ge.s32.totalorder %s771_s15, 1 }
   0x9   : > { %p830_p4 = por %p1028_p1, %p40_p0  ;;  %p119_p7 = scmp.lt.s32.totalorder %s771_s15, 3 }
   0xa   : > { %p835_p6 = por %p112_p3, %p40_p0  ;;  %s773_s21 = smov [#allocation5]  }
   0xb   : > { %s1031_s18 = scalar_select %p830_p4, 1, 0 }
   0xc   : > { %s1032_s19 = scalar_select %p835_p6, 1, 0 }
   0xd   : > { %p840_p8 = pnand %p448_p5, %p119_p7  ;;  %s131_s22 = sshll.u32 %s773_s21, 4  ;;  %s844_s22 = int_to_ptr.vmem [resolvable:$true] %s131_s22 }
   0xe   : > { %s856_s24 = sadd.s32 1, %s771_s15   ;;  %s27_s25 = sadd.s32 1, %s767_s14 }
   0xf   : > { %s1033_s20 = scalar_select %p840_p8, 1, 0 }
  0x10   : > { %p590_p9 = pneg %p840_p8  ;;  %s24_s26 = ssub.s32 %s771_s15, %s856_s24 }
  0x11   : > { %s643_s29 = scalar_lea.hbm %s1025_s1, 2048 }
  0x12   : > { %p851_p11 = pnand %p590_p9, %p1028_p1  ;;  %p644_p12 = scmp.ne.s32.totalorder %s1025_s1, %s643_s29 }
  0x13   : > { %p650_p5 = scmp.lt.u32.totalorder %s643_s29, %s1025_s1 }
  0x14   : > { %p645_p13 = pneg %p851_p11 }
  0x16   : > { %p646_p0 = pnand %p645_p13, %p644_p12 }
  0x18   : > { %p647_p3 = pneg %p646_p0 }
  0x1a   : > { %p652_p7 = pnand %p650_p5, %p647_p3 }
  0x1c   : > { %655 = shalt.err (!%p652_p7)
}
  0x1d   : > { %s656_s7 = scalar_lea.vmem %s844_s22, 2048  ;;  %p664_p2 = scmp.lt.s32.totalorder %s844_s22, %s844_s22 }
  0x1e   : > { %p657_p9 = scmp.ne.s32.totalorder %s844_s22, %s656_s7  ;;  %p665_p6 = scmp.lt.s32.totalorder %s656_s7, %s656_s7 }
  0x20   : > { %p659_p10 = pnand %p657_p9, %p645_p13  ;;  %p666_p4 = por %p665_p6, %p664_p2 }
  0x22   : > { %p660_p1 = pneg %p659_p10 }
  0x24   : > { %p667_p8 = pnand %p666_p4, %p660_p1 }
  0x26   : > { %670 = shalt.err (!%p667_p8)
}
  0x27   : > { %s774_s8 = smov 128   ;;  %s775_s9 = smov 8  }
  0x28   : > { %593 = dma.hbm_to_vmem [thread:$0]  (!%p851_p11), %s1025_s1, 2048, %s844_s22, [#allocation6], %s774_s8, %s774_s8, %s775_s9  }
  0x29   : > { %p25_p1 = scmp.eq.s32.totalorder %s24_s26, 0  ;;  %p34_p2 = scmp.ne.s32.totalorder %s767_s14, %s763_s13 }
  0x2a   : > { %p35_p4 = scmp.eq.s32.totalorder %s771_s15, 0  ;;  %p603_p6 = scmp.lt.s32.totalorder %s771_s15, 2 }
  0x2b   : > { %s890_s17 = scalar_select %p25_p1, %s767_s14, %s27_s25  }
  0x2c   : > { %p36_p8 = por %p35_p4, %p34_p2  ;;  %p1035_p10 = scmp.eq.s32.totalorder %s821_s16, 1 }
  0x2d   : > { %s148_s23 = sand.u32 1, %s767_s14   ;;  %s464_s27 = sshll.u32 %s771_s15, 10 }
  0x2e   : > { %p894_p12 = por %p1035_p10, %p34_p2  ;;  %s451_s28 = sshll.u32 %s148_s23, 6 }
  0x2f   : > { %s903_s4 = scalar_lea.hbm %s1024_s0, %s464_s27  ;;  %s152_s22 = scalar_lea.vmem [#allocation2], %s451_s28 }
  0x30   : > { %s159_s25 = sshll.u32 %s152_s22, 4  ;;  %p905_p11 = pnand %p603_p6, %p36_p8  ;;  %s909_s25 = int_to_ptr.vmem [resolvable:$true] %s159_s25 }
  0x31   : > { %s911_s5 = scalar_lea.sflag [#allocation3], %s148_s23  ;;  %s671_s6 = scalar_lea.hbm %s903_s4, 1024 }
  0x32   : > { %p672_p13 = scmp.ne.s32.totalorder %s903_s4, %s671_s6  ;;  %p673_p0 = pneg %p905_p11 }
  0x33   : > { %s676_s11 = scalar_lea.hbm %s1024_s0, 2048  ;;  %p677_p7 = scmp.lt.u32.totalorder %s903_s4, %s1024_s0 }
  0x34   : > { %p674_p3 = pnand %p673_p0, %p672_p13  ;;  %p678_p9 = scmp.lt.u32.totalorder %s676_s11, %s671_s6 }
  0x35   : > { %p680_p2 = scmp.lt.u32.totalorder %s671_s6, %s903_s4 }
  0x36   : > { %p675_p5 = pneg %p674_p3  ;;  %p679_p1 = por %p678_p9, %p677_p7 }
  0x38   : > { %p681_p4 = por %p680_p2, %p679_p1 }
  0x3a   : > { %p682_p6 = pnand %p681_p4, %p675_p5 }
  0x3c   : > { %685 = shalt.err (!%p682_p6)
}
  0x3d   : > { %s686_s23 = scalar_lea.vmem %s909_s25, 1024  ;;  %s776_s29 = smov [#allocation2]  }
  0x3e   : > { %p687_p8 = scmp.ne.s32.totalorder %s909_s25, %s686_s23  ;;  %s691_s30 = sshll.u32 %s776_s29, 4  ;;  %s692_s30 = int_to_ptr.vmem [resolvable:$false] %s691_s30 }
  0x3f   : > { %s693_s22 = scalar_lea.vmem %s692_s30, 2048  ;;  %p694_p3 = scmp.lt.s32.totalorder %s909_s25, %s692_s30 }
  0x40   : > { %p689_p10 = pnand %p687_p8, %p673_p0  ;;  %p695_p7 = scmp.lt.s32.totalorder %s693_s22, %s686_s23 }
  0x42   : > { %p690_p13 = pneg %p689_p10  ;;  %p696_p9 = por %p695_p7, %p694_p3 }
  0x44   : > { %p697_p1 = pnand %p696_p9, %p690_p13 }
  0x46   : > { %700 = shalt.err (!%p697_p1)
}
  0x47   : > { %597 = dma.hbm_to_vmem [thread:$0]  (!%p905_p11), %s903_s4, 1024, %s909_s25, %s911_s5, %s774_s8, %s774_s8, %s775_s9  }
  0x48   : > { %p1038_p0 = scmp.ne.s32.totalorder %s1033_s20, 0 }
  0x49   : > { %s945_s6 = sand.u32 (!%p1038_p0), 1, %s763_s13   ;;  %p1039_p5 = scmp.ne.s32.totalorder (!%p1038_p0), %s1031_s18, 0 }
  0x4a   : > { %171 = sbr.rel (%p1038_p0) target bundleno = 354 (0x162), region = 32  ;;  %s455_s7 = sshll.u32 (!%p1038_p0), %s945_s6, 6 }
  0x4b   : > { %s174_s10 = scalar_lea.sflag (!%p1038_p0), [#allocation3], %s945_s6  ;;  %s951_s26 = scalar_lea.vmem (!%p1038_p0), [#allocation2], %s455_s7 }
  0x51   : > { %746 = dma.done.wait (%p1039_p5), %s174_s10, 1024  }
  0x52   : > { %748 = vsyncadd (%p1039_p5), %s174_s10, 4294966272  ;;  %p1040_p11 = scmp.eq.s32.totalorder %s821_s16, 0 }
  0x54   : > { %750 = dma.done.wait (%p1040_p11), [#allocation6], 2048   ;;  %p1041_p2 = pmov %p1040_p11 }
  0x55   : > { %v214_v0 = vld [vmem:[#allocation5] sm:$0xff]  ;;  %v215_v1 = vld [vmem:[#allocation5 + $0x8] sm:$0xff]  ;;  %v216_v2 = vld [vmem:[#allocation5 + $0x10] sm:$0xff]  ;;  %s203_s8 = scalar_lea.vmem [#allocation7], %s455_s7  ;;  %s465_s4 = sshll.u32 %s821_s16, 10 }
  0x56   : > { %752 = vsyncadd (%p1041_p2), [#allocation6], 4294965248  ;;  %v534_v3 = vpack.c.bf16 %v215_v1, %v214_v0  ;;  %v217_v4 = vld [vmem:[#allocation5 + $0x18] sm:$0xff]  ;;  %v218_v6 = vld [vmem:[#allocation5 + $0x20] sm:$0xff]  ;;  %s364_s9 = sshll.u32 %s203_s8, 4  ;;  %s980_s16 = scalar_lea.hbm %s1027_s3, %s465_s4  ;;  %s975_s9 = int_to_ptr.vmem [resolvable:$true] %s364_s9 }
  0x57   : > { %v538_v5 = vpack.c.bf16 %v217_v4, %v216_v2  ;;  %v219_v7 = vld [vmem:[#allocation5 + $0x28] sm:$0xff]  ;;  %v206_v9 = vld [vmem:[%s951_s26] sm:$0xff]  ;;  %v220_v11 = vld [vmem:[#allocation5 + $0x30] sm:$0xff]  ;;  %s351_s11 = scalar_lea.sflag [#allocation4], %s945_s6  ;;  %s701_s27 = scalar_lea.vmem %s975_s9, 1024 }
  0x58   : > { %535 = vmatprep.subr.bf16.mxu0 %v534_v3  ;;  %566 = vmatprep.subr.bf16.mxu1 %v534_v3  ;;  %v542_v8 = vpack.c.bf16 %v219_v7, %v218_v6  ;;  %v210_v10 = vld [vmem:[%s951_s26 + $0x20] sm:$0xff]  ;;  %v221_v12 = vld [vmem:[#allocation5 + $0x38] sm:$0xff]  ;;  %v223_v15 = vld [vmem:[#allocation5 + $0x48] sm:$0xff]  ;;  %p702_p4 = scmp.ne.s32.totalorder %s975_s9, %s701_s27  ;;  %s777_s28 = smov [#allocation7]  }
  0x59   : > { %537 = vmatpush3.bf16.msra.mxu0 %v534_v3  ;;  %574 = vmatpush3.bf16.msra.mxu1 %v534_v3  ;;  %v546_v13 = vpack.c.bf16 %v221_v12, %v220_v11  ;;  %v222_v14 = vld [vmem:[#allocation5 + $0x40] sm:$0xff]  ;;  %v224_v17 = vld [vmem:[#allocation5 + $0x50] sm:$0xff]  ;;  %v225_v18 = vld [vmem:[#allocation5 + $0x58] sm:$0xff]  ;;  %s705_s23 = sshll.u32 %s777_s28, 4  ;;  %s706_s23 = int_to_ptr.vmem [resolvable:$false] %s705_s23 }
  0x5a   : > { %539 = vmatprep.subr.bf16.mxu0 %v538_v5  ;;  %567 = vmatprep.subr.bf16.mxu1 %v538_v5  ;;  %v550_v16 = vpack.c.bf16 %v223_v15, %v222_v14  ;;  %v554_v19 = vpack.c.bf16 %v225_v18, %v224_v17  ;;  %v226_v20 = vld [vmem:[#allocation5 + $0x60] sm:$0xff]  ;;  %v227_v21 = vld [vmem:[#allocation5 + $0x68] sm:$0xff]  ;;  %v228_v23 = vld [vmem:[#allocation5 + $0x70] sm:$0xff]  ;;  %p703_p6 = pnand %p702_p4, %p894_p12  ;;  %s707_s29 = scalar_lea.vmem %s706_s23, 2048 }
  0x5b   : > { %522 = vmatprep.mubr.f32.mxu0 %v206_v9  ;;  %528 = vmatprep.mubr.f32.mxu1 %v210_v10  ;;  %v558_v22 = vpack.c.bf16 %v227_v21, %v226_v20  ;;  %v229_v24 = vld [vmem:[#allocation5 + $0x78] sm:$0xff]  ;;  %v207_v26 = vld [vmem:[%s951_s26 + $0x8] sm:$0xff]  ;;  %v208_v28 = vld [vmem:[%s951_s26 + $0x10] sm:$0xff]  ;;  %p708_p10 = scmp.lt.s32.totalorder %s975_s9, %s706_s23  ;;  %p709_p13 = scmp.lt.s32.totalorder %s707_s29, %s701_s27 }
  0x5c   : > { %v562_v25 = vpack.c.bf16 %v229_v24, %v228_v23  ;;  %v211_v27 = vld [vmem:[%s951_s26 + $0x28] sm:$0xff]  ;;  %v212_v29 = vld [vmem:[%s951_s26 + $0x30] sm:$0xff]  ;;  %v209_v30 = vld [vmem:[%s951_s26 + $0x18] sm:$0xff]  ;;  %p704_p8 = pneg %p703_p6 }
  0x5d   : > { %541 = vmatpush3.bf16.msra.mxu0 %v538_v5  ;;  %575 = vmatpush3.bf16.msra.mxu1 %v538_v5  ;;  %v213_v31 = vld [vmem:[%s951_s26 + $0x38] sm:$0xff]  ;;  %v458_v32 = vld [vmem:[%s1026_s2] ss:$0 sm:$0xff]  ;;  %p710_p3 = por %p709_p13, %p708_p10 }
  0x5e   : > { %543 = vmatprep.subr.bf16.mxu0 %v542_v8  ;;  %568 = vmatprep.subr.bf16.mxu1 %v542_v8 }
  0x5f   : > { %p711_p7 = pnand %p710_p3, %p704_p8 }
  0x61   : > { %545 = vmatpush3.bf16.msra.mxu0 %v542_v8  ;;  %576 = vmatpush3.bf16.msra.mxu1 %v542_v8 }
  0x62   : > { %547 = vmatprep.subr.bf16.mxu0 %v546_v13  ;;  %569 = vmatprep.subr.bf16.mxu1 %v546_v13 }
  0x65   : > { %549 = vmatpush3.bf16.msra.mxu0 %v546_v13  ;;  %577 = vmatpush3.bf16.msra.mxu1 %v546_v13 }
  0x66   : > { %551 = vmatprep.subr.bf16.mxu0 %v550_v16  ;;  %570 = vmatprep.subr.bf16.mxu1 %v550_v16 }
  0x69   : > { %553 = vmatpush3.bf16.msra.mxu0 %v550_v16  ;;  %578 = vmatpush3.bf16.msra.mxu1 %v550_v16 }
  0x6a   : > { %555 = vmatprep.subr.bf16.mxu0 %v554_v19  ;;  %571 = vmatprep.subr.bf16.mxu1 %v554_v19 }
  0x6d   : > { %557 = vmatpush3.bf16.msra.mxu0 %v554_v19  ;;  %579 = vmatpush3.bf16.msra.mxu1 %v554_v19 }
  0x6e   : > { %559 = vmatprep.subr.bf16.mxu0 %v558_v22  ;;  %572 = vmatprep.subr.bf16.mxu1 %v558_v22 }
  0x71   : > { %561 = vmatpush3.bf16.msra.mxu0 %v558_v22  ;;  %580 = vmatpush3.bf16.msra.mxu1 %v558_v22 }
  0x72   : > { %563 = vmatprep.subr.bf16.mxu0 %v562_v25  ;;  %573 = vmatprep.subr.bf16.mxu1 %v562_v25 }
  0x75   : > { %565 = vmatpush3.bf16.msra.mxu0 %v562_v25  ;;  %581 = vmatpush3.bf16.msra.mxu1 %v562_v25 }
  0x78   : > { %523 = vmatmul.mubr.f32.vlgmr.msra.gmra.mrb[0].mxu0 %v207_v26  ;;  %529 = vmatmul.mubr.f32.vlgmr.msra.gmra.mrb[0].mxu1 %v211_v27 }
  0x79   : > { %525 = vmatprep.mubr.f32.mxu0 %v208_v28  ;;  %531 = vmatprep.mubr.f32.mxu1 %v212_v29 }
  0x7c   : > { %526 = vmatmul.mubr.f32.gmra.mrb[2].mxu0 %v209_v30  ;;  %532 = vmatmul.mubr.f32.gmra.mrb[2].mxu1 %v213_v31 }
 0x14b   : > { %v524_v33 = vpop.f32.mrb[0].mxu0  ;;  %v530_v34 = vpop.f32.mrb[0].mxu1 }
 0x14c   : > { %v309_v35 = vadd.f32 %v524_v33, %v458_v32  ;;  %v329_v36 = vadd.f32 %v530_v34, %v458_v32  ;;  %v303_v37 = vpop.f32.mrb[1].mxu0  ;;  %v323_v38 = vpop.f32.mrb[1].mxu1 }
 0x14d   : > { %v304_v39 = vadd.f32 %v458_v32, %v303_v37  ;;  %v324_v40 = vadd.f32 %v458_v32, %v323_v38 }
 0x14e   : > { %343 = vst [vmem:[%s203_s8 + $0x8] sm:$0xff] %v309_v35  ;;  %347 = vst [vmem:[%s203_s8 + $0x28] sm:$0xff] %v329_v36 }
 0x14f   : > { %342 = vst [vmem:[%s203_s8] sm:$0xff] %v304_v39  ;;  %346 = vst [vmem:[%s203_s8 + $0x20] sm:$0xff] %v324_v40  ;;  %v527_v41 = vpop.f32.mrb[2].mxu0  ;;  %v533_v42 = vpop.f32.mrb[2].mxu1 }
 0x150   : > { %v319_v43 = vadd.f32 %v527_v41, %v458_v32  ;;  %v339_v44 = vadd.f32 %v533_v42, %v458_v32  ;;  %v313_v45 = vpop.f32.mrb[3].mxu0  ;;  %v333_v46 = vpop.f32.mrb[3].mxu1 }
 0x151   : > { %v314_v47 = vadd.f32 %v458_v32, %v313_v45  ;;  %v334_v48 = vadd.f32 %v458_v32, %v333_v46 }
 0x152   : > { %345 = vst [vmem:[%s203_s8 + $0x18] sm:$0xff] %v319_v43  ;;  %349 = vst [vmem:[%s203_s8 + $0x38] sm:$0xff] %v339_v44 }
 0x153   : > { %344 = vst [vmem:[%s203_s8 + $0x10] sm:$0xff] %v314_v47  ;;  %348 = vst [vmem:[%s203_s8 + $0x30] sm:$0xff] %v334_v48 }
 0x154   : > { %714 = shalt.err (!%p711_p7)
}
 0x155   : > { %s715_s30 = scalar_lea.hbm %s980_s16, 1024  ;;  %s719_s10 = scalar_lea.hbm %s1027_s3, 2048 }
 0x156   : > { %p716_p9 = scmp.ne.s32.totalorder %s980_s16, %s715_s30  ;;  %p720_p5 = scmp.lt.u32.totalorder %s980_s16, %s1027_s3 }
 0x157   : > { %p721_p11 = scmp.lt.u32.totalorder %s719_s10, %s715_s30  ;;  %p723_p4 = scmp.lt.u32.totalorder %s715_s30, %s980_s16 }
 0x158   : > { %p717_p1 = pnand %p716_p9, %p894_p12 }
 0x159   : > { %p722_p2 = por %p721_p11, %p720_p5 }
 0x15a   : > { %p718_p0 = pneg %p717_p1 }
 0x15b   : > { %p724_p6 = por %p723_p4, %p722_p2 }
 0x15d   : > { %p725_p8 = pnand %p724_p6, %p718_p0 }
 0x15f   : > { %728 = shalt.err (!%p725_p8)
}
 0x160   : > { %s778_s20 = smov 128   ;;  %s779_s8 = smov 8  }
 0x161   : > { %588 = dma.vmem_to_hbm [thread:$0]  (%p894_p12), %s975_s9, 1024, %s980_s16, %s351_s11, %s778_s20, %s778_s20, %s779_s8  }
 0x162 PF: > { %s379_s4 = sand.u32 1, %s759_s12   ;;  %p1042_p10 = scmp.ne.s32.totalorder %s1032_s19, 0 }
 0x163   : > { %p1043_p13 = scmp.ge.s32.totalorder %s771_s15, 2  ;;  %s380_s25 = scalar_lea.sflag [#allocation4], %s379_s4 }
 0x165   : > { %p599_p3 = pnand %p1043_p13, %p1042_p10 }
 0x167   : > { %754 = dma.done.wait (!%p599_p3), %s380_s25, 1024  }
 0x168   : > { %756 = vsyncadd (!%p599_p3), %s380_s25, 4294966272  ;;  %p17_p7 = scmp.ge.s32.totalorder %s856_s24, 4   ;;  %s1044_s12 = smov %s763_s13 }
 0x169   : > { %s1045_s13 = smov %s767_s14  ;;  %s1046_s14 = smov %s890_s17 }
 0x16a   : > { %s1047_s15 = smov %s856_s24  ;;  %19 = sbr.rel (!%p17_p7) target bundleno = 6 (0x6), region = 81 }
 0x171   :  { %385 = vsyncpa [#allocation3], 1 }
 0x172   :  { %387 = vsyncpa [#allocation3 + $0x1], 1 }
 0x173   :  { %388 = vsyncpa [#allocation6], 1 }
 0x174   :  { %389 = vsyncpa [#allocation4], 1 }
 0x175   :  { %391 = vsyncpa [#allocation4 + $0x1], 1 }

</bundles_post_ra>
